<compile_context>
chip_gen: v6e
topology: v6e:2x2x1
jax: 0.10.0
libtpu: 0.0.40
codegen_flags: <defaults>
</compile_context>

<pallas_src>
import functools

import jax
import jax.numpy as jnp
from jax.experimental import pallas as pl
from jax.experimental.pallas import tpu as pltpu


def _make_divisible(v, divisor, min_value=None):
    if min_value is None:
        min_value = divisor
    new_v = max(min_value, int(v + divisor / 2) // divisor * divisor)
    if new_v < 0.9 * v:
        new_v += divisor
    return new_v


def _pick_tb(B, per_batch_bytes, target_bytes=1 << 20):
    """Largest divisor of B with block <= ~1 MiB, keeping >= 2 grid steps."""
    tb_cap = max(1, target_bytes // max(per_batch_bytes, 1))
    tb_cap = int(min(tb_cap, B))
    if B >= 2:
        # Keep at least 2 grid steps so both v7x TensorCores can be used.
        tb_cap = min(tb_cap, max(1, B // 2))
    tb = 1
    for d in range(1, tb_cap + 1):
        if B % d == 0:
            tb = d
    return tb


def _se_kernel(x_ref, w1_ref, b1_ref, w2_ref, b2_ref, o_ref, *, inv_hw):
    # x_ref: (TB, C, HWp). Any lane padding beyond the true HW is zeros.
    x = x_ref[...]

    # Global average pool: lane-axis reduction in f32, scale by 1/HW_true
    # (padding zeros do not affect the sum).
    pooled = jnp.sum(x.astype(jnp.float32), axis=-1) * inv_hw            # (TB, C)

    # conv_reduce (1x1) + bias, ReLU: (TB, C) @ (C, R) -> (TB, R)
    h = jnp.dot(pooled, w1_ref[...], preferred_element_type=jnp.float32)
    h = jnp.maximum(h + b1_ref[...], 0.0)

    # conv_expand (1x1) + bias: (TB, R) @ (R, C) -> (TB, C)
    s = jnp.dot(h, w2_ref[...], preferred_element_type=jnp.float32) + b2_ref[...]

    # hard_sigmoid gate on the small (TB, C) tensor: relu6(s + 3) / 6
    gate = jnp.clip(s + 3.0, 0.0, 6.0) * (1.0 / 6.0)

    # Single broadcast multiply over spatial, in the input dtype.
    o_ref[...] = (x * gate.astype(x.dtype)[:, :, None]).astype(o_ref.dtype)


def squeeze_excite(x_nchw, w_reduce, b_reduce, w_expand, b_expand):
    """x_nchw: (B, C, H, W). w_reduce: (R, C), b_reduce: (R,), w_expand: (C, R), b_expand: (C,)."""
    B, C, H, W = x_nchw.shape
    R = w_reduce.shape[0]
    HW = H * W
    HWp = ((HW + 127) // 128) * 128        # lane-dense last dim (multiple of 128)

    x3 = x_nchw.reshape(B, C, HW)
    if HWp != HW:
        x3 = jnp.pad(x3, ((0, 0), (0, 0), (0, HWp - HW)))

    # Pre-transpose 1x1-conv weights so the kernel does row-major matmuls.
    w1 = jnp.transpose(w_reduce)           # (C, R)
    w2 = jnp.transpose(w_expand)           # (R, C)
    b1 = b_reduce.reshape(1, R)            # lane-major bias rows
    b2 = b_expand.reshape(1, C)

    itemsize = jnp.dtype(x_nchw.dtype).itemsize
    per_batch_bytes = C * HWp * itemsize
    TB = _pick_tb(B, per_batch_bytes)
    grid = (B // TB,)

    block_bytes = TB * per_batch_bytes
    # 2x double-buffered input + 2x output + weights/bias + headroom; 16 MiB
    # floor is safe on v5e/v6e/v7x and well under v7x's 64 MiB physical VMEM.
    vmem_limit = int(max(16 << 20, 6 * block_bytes))

    kernel = functools.partial(_se_kernel, inv_hw=1.0 / HW)

    out = pl.pallas_call(
        kernel,
        out_shape=jax.ShapeDtypeStruct((B, C, HWp), x_nchw.dtype),
        grid_spec=pltpu.PrefetchScalarGridSpec(
            num_scalar_prefetch=0,
            grid=grid,
            in_specs=[
                pl.BlockSpec((TB, C, HWp), lambda b: (b, 0, 0)),  # x (TB batches/step)
                pl.BlockSpec((C, R), lambda b: (0, 0)),           # w_reduce^T
                pl.BlockSpec((1, R), lambda b: (0, 0)),           # b_reduce
                pl.BlockSpec((R, C), lambda b: (0, 0)),           # w_expand^T
                pl.BlockSpec((1, C), lambda b: (0, 0)),           # b_expand
            ],
            out_specs=pl.BlockSpec((TB, C, HWp), lambda b: (b, 0, 0)),
        ),
        compiler_params=pltpu.CompilerParams(
            dimension_semantics=("parallel",),
            vmem_limit_bytes=vmem_limit,
        ),
    )(x3, w1, b1, w2, b2)

    if HWp != HW:
        out = out[..., :HW]
    return out.reshape(B, C, H, W)


def squeeze_excite_ref(x, w1, b1, w2, b2):
    """Pure-JAX reference matching the PyTorch forward."""
    pooled = jnp.mean(x, axis=(2, 3), keepdims=True)                       # (B,C,1,1)
    h = jnp.einsum("bcij,rc->brij", pooled, w1) + b1[None, :, None, None]  # (B,R,1,1)
    h = jnp.maximum(h, 0.0)
    s = jnp.einsum("brij,cr->bcij", h, w2) + b2[None, :, None, None]       # (B,C,1,1)
    gate = jnp.clip(s + 3.0, 0.0, 6.0) / 6.0
    return x * gate


if __name__ == "__main__":
    # Module config: in_chs=16, se_ratio=0.25, divisor=4 -> reduced_chs=4
    in_chs = 16
    se_ratio = 0.25
    divisor = 4
    reduced_chs = _make_divisible(in_chs * se_ratio, divisor)

    key = jax.random.PRNGKey(0)
    kx, kw1, kb1, kw2, kb2 = jax.random.split(key, 5)

    # Conv2d 1x1 weights: (out_ch, in_ch, 1, 1) -> stored as (out_ch, in_ch)
    w_reduce = jax.random.normal(kw1, (reduced_chs, in_chs), dtype=jnp.float32) * 0.1
    b_reduce = jax.random.normal(kb1, (reduced_chs,), dtype=jnp.float32) * 0.1
    w_expand = jax.random.normal(kw2, (in_chs, reduced_chs), dtype=jnp.float32) * 0.1
    b_expand = jax.random.normal(kb2, (in_chs,), dtype=jnp.float32) * 0.1

    # Case 1: lane-dense spatial (HW = 256), batched grid (TB=4, 2 grid steps).
    B, C, H, W = 8, in_chs, 16, 16
    x = jax.random.normal(kx, (B, C, H, W), dtype=jnp.float32)
    out = jax.block_until_ready(squeeze_excite(x, w_reduce, b_reduce, w_expand, b_expand))
    ref = squeeze_excite_ref(x, w_reduce, b_reduce, w_expand, b_expand)
    assert out.shape == (B, C, H, W)
    assert jnp.allclose(out, ref, atol=1e-5, rtol=1e-5)

    # Case 2: HW = 64 (< 128) exercises the explicit lane-padding path.
    B2, H2, W2 = 2, 8, 8
    x2 = jax.random.normal(kx, (B2, C, H2, W2), dtype=jnp.float32)
    out2 = jax.block_until_ready(squeeze_excite(x2, w_reduce, b_reduce, w_expand, b_expand))
    ref2 = squeeze_excite_ref(x2, w_reduce, b_reduce, w_expand, b_expand)
    assert out2.shape == (B2, C, H2, W2)
    assert jnp.allclose(out2, ref2, atol=1e-5, rtol=1e-5)

    print("KERNEL_OK")
</pallas_src>

<mosaic_0001>
module attributes {stable_mosaic.version = 11 : i64} {
  func.func @_se_kernel(%arg0: i32, %arg1: memref<4x16x256xf32, #tpu.memory_space<vmem>>, %arg2: memref<16x4xf32, #tpu.memory_space<vmem>>, %arg3: memref<1x4xf32, #tpu.memory_space<vmem>>, %arg4: memref<4x16xf32, #tpu.memory_space<vmem>>, %arg5: memref<1x16xf32, #tpu.memory_space<vmem>>, %arg6: memref<4x16x256xf32, #tpu.memory_space<vmem>>) attributes {dimension_semantics = [#tpu.dimension_semantics<parallel>], iteration_bounds = array<i64: 2>, scalar_prefetch = 0 : i64, scratch_operands = 0 : i64, tpu.core_type = #tpu.core_type<tc>, window_params = [{transform_indices = @transform_0, window_bounds = array<i64: 4, 16, 256>}, {pipeline_mode = #tpu.pipeline_mode<synchronous>, transform_indices = @transform_1, window_bounds = array<i64: 16, 4>}, {pipeline_mode = #tpu.pipeline_mode<synchronous>, transform_indices = @transform_2, window_bounds = array<i64: 1, 4>}, {pipeline_mode = #tpu.pipeline_mode<synchronous>, transform_indices = @transform_3, window_bounds = array<i64: 4, 16>}, {pipeline_mode = #tpu.pipeline_mode<synchronous>, transform_indices = @transform_4, window_bounds = array<i64: 1, 16>}, {transform_indices = @transform_5, window_bounds = array<i64: 4, 16, 256>}]} {
    %c0 = arith.constant 0 : index
    %c0_0 = arith.constant 0 : index
    %c0_1 = arith.constant 0 : index
    %0 = vector.load %arg1[%c0, %c0_0, %c0_1] : memref<4x16x256xf32, #tpu.memory_space<vmem>>, vector<4x16x256xf32>
    %cst = arith.constant dense<0.000000e+00> : vector<4x16xf32>
    %1 = vector.multi_reduction <add>, %0, %cst [2] : vector<4x16x256xf32> to vector<4x16xf32>
    %cst_2 = arith.constant 3.906250e-03 : f32
    %2 = vector.broadcast %cst_2 : f32 to vector<4x16xf32>
    %3 = arith.mulf %1, %2 : vector<4x16xf32>
    %c0_3 = arith.constant 0 : index
    %c0_4 = arith.constant 0 : index
    %4 = vector.load %arg2[%c0_3, %c0_4] : memref<16x4xf32, #tpu.memory_space<vmem>>, vector<16x4xf32>
    %cst_5 = arith.constant dense<0.000000e+00> : vector<4x4xf32>
    %5 = tpu.matmul %3, %4, %cst_5 {dimension_numbers = #tpu.dot_dimension_numbers<[1], [0], [0], [1], [0, 0, 1, 1], [], []>} : vector<4x16xf32>, vector<16x4xf32>, vector<4x4xf32> -> vector<4x4xf32>
    %c0_6 = arith.constant 0 : index
    %c0_7 = arith.constant 0 : index
    %6 = vector.load %arg3[%c0_6, %c0_7] : memref<1x4xf32, #tpu.memory_space<vmem>>, vector<1x4xf32>
    %7 = vector.broadcast %6 : vector<1x4xf32> to vector<4x4xf32>
    %8 = arith.addf %5, %7 : vector<4x4xf32>
    %cst_8 = arith.constant 0.000000e+00 : f32
    %9 = vector.broadcast %cst_8 : f32 to vector<4x4xf32>
    %10 = arith.maximumf %8, %9 : vector<4x4xf32>
    %c0_9 = arith.constant 0 : index
    %c0_10 = arith.constant 0 : index
    %11 = vector.load %arg4[%c0_9, %c0_10] : memref<4x16xf32, #tpu.memory_space<vmem>>, vector<4x16xf32>
    %cst_11 = arith.constant dense<0.000000e+00> : vector<4x16xf32>
    %12 = tpu.matmul %10, %11, %cst_11 {dimension_numbers = #tpu.dot_dimension_numbers<[1], [0], [0], [1], [0, 0, 1, 1], [], []>} : vector<4x4xf32>, vector<4x16xf32>, vector<4x16xf32> -> vector<4x16xf32>
    %c0_12 = arith.constant 0 : index
    %c0_13 = arith.constant 0 : index
    %13 = vector.load %arg5[%c0_12, %c0_13] : memref<1x16xf32, #tpu.memory_space<vmem>>, vector<1x16xf32>
    %14 = vector.broadcast %13 : vector<1x16xf32> to vector<4x16xf32>
    %15 = arith.addf %12, %14 : vector<4x16xf32>
    %cst_14 = arith.constant 3.000000e+00 : f32
    %16 = vector.broadcast %cst_14 : f32 to vector<4x16xf32>
    %17 = arith.addf %15, %16 : vector<4x16xf32>
    %cst_15 = arith.constant 0.000000e+00 : f32
    %cst_16 = arith.constant 6.000000e+00 : f32
    %18 = vector.broadcast %cst_15 : f32 to vector<4x16xf32>
    %19 = arith.maximumf %18, %17 : vector<4x16xf32>
    %20 = vector.broadcast %cst_16 : f32 to vector<4x16xf32>
    %21 = arith.minimumf %20, %19 : vector<4x16xf32>
    %cst_17 = arith.constant 0.166666672 : f32
    %22 = vector.broadcast %cst_17 : f32 to vector<4x16xf32>
    %23 = arith.mulf %21, %22 : vector<4x16xf32>
    %24 = vector.shape_cast %23 : vector<4x16xf32> to vector<4x16x1xf32>
    %25 = vector.broadcast %24 : vector<4x16x1xf32> to vector<4x16x256xf32>
    %26 = arith.mulf %0, %25 : vector<4x16x256xf32>
    %c0_18 = arith.constant 0 : index
    %c0_19 = arith.constant 0 : index
    %c0_20 = arith.constant 0 : index
    %27 = vector.load %arg6[%c0_18, %c0_19, %c0_20] : memref<4x16x256xf32, #tpu.memory_space<vmem>>, vector<4x16x256xf32>
    tpu.vector_store %arg6[%c0_18, %c0_19, %c0_20], %26 {strides = array<i32>} : memref<4x16x256xf32, #tpu.memory_space<vmem>>, vector<4x16x256xf32>,
    return
  }
  func.func @transform_0(%arg0: i32) -> (i32, i32, i32) {
    %c0_i32 = arith.constant 0 : i32
    %c0_i32_0 = arith.constant 0 : i32
    %c0_i32_1 = arith.constant 0 : i32
    return %arg0, %c0_i32, %c0_i32_0 : i32, i32, i32
  }
  func.func @transform_1(%arg0: i32) -> (i32, i32) {
    %c0_i32 = arith.constant 0 : i32
    %c0_i32_0 = arith.constant 0 : i32
    %c0_i32_1 = arith.constant 0 : i32
    return %c0_i32, %c0_i32_0 : i32, i32
  }
  func.func @transform_2(%arg0: i32) -> (i32, i32) {
    %c0_i32 = arith.constant 0 : i32
    %c0_i32_0 = arith.constant 0 : i32
    %c0_i32_1 = arith.constant 0 : i32
    return %c0_i32, %c0_i32_0 : i32, i32
  }
  func.func @transform_3(%arg0: i32) -> (i32, i32) {
    %c0_i32 = arith.constant 0 : i32
    %c0_i32_0 = arith.constant 0 : i32
    %c0_i32_1 = arith.constant 0 : i32
    return %c0_i32, %c0_i32_0 : i32, i32
  }
  func.func @transform_4(%arg0: i32) -> (i32, i32) {
    %c0_i32 = arith.constant 0 : i32
    %c0_i32_0 = arith.constant 0 : i32
    %c0_i32_1 = arith.constant 0 : i32
    return %c0_i32, %c0_i32_0 : i32, i32
  }
  func.func @transform_5(%arg0: i32) -> (i32, i32, i32) {
    %c0_i32 = arith.constant 0 : i32
    %c0_i32_0 = arith.constant 0 : i32
    %c0_i32_1 = arith.constant 0 : i32
    return %arg0, %c0_i32, %c0_i32_0 : i32, i32, i32
  }
}

</mosaic_0001>

<bundles_post_ra>
// kernel: tpu_custom_call.1
= control target key start
LH: loop header
LB: loop body
LE: loop exit
PB: predicated region body
PF: predicated region fallthrough
CT: control target
= control target key end

     0   :  { %10 = vsyncpa [#allocation3], 0  ;;  %s1179_s0 = inlined_call_operand.hbm [shape: f32[8,16,256], index: 0, kind: input, shape index: {}]   ;;  %s1180_s1 = inlined_call_operand.vmem [shape: f32[16,4], index: 1, kind: input, shape index: {}]   ;;  %s1181_s2 = inlined_call_operand.vmem [shape: f32[1,4], index: 2, kind: input, shape index: {}]   ;;  %s1182_s3 = inlined_call_operand.vmem [shape: f32[4,16], index: 3, kind: input, shape index: {}]   ;;  %s1183_s4 = inlined_call_operand.vmem [shape: f32[1,16], index: 4, kind: input, shape index: {}]   ;;  %s1184_s5 = inlined_call_operand.hbm [shape: f32[8,16,256], index: 5, kind: output, shape index: {}]  }
   0x1   :  { %12 = vsyncpa [#allocation3 + $0x1], 0 }
   0x2   :  { %13 = vsyncpa [#allocation4], 0 }
   0x3   :  { %15 = vsyncpa [#allocation4 + $0x1], 0  ;;  %s911_s18 = smov 0   ;;  %s913_s19 = smov 0  }
   0x4   :  { %s915_s20 = smov 0   ;;  %s917_s21 = smov 0  }
   0x5 LB: > { %s932_s22 = sadd.s32 4294967295, %s871_s21   ;;  %s685_s23 = sadd.s32 4294967294, %s871_s21   ;;  %s871_s21 = sphi %s917_s21, %s1199_s21   ;;  %s867_s20 = sphi %s915_s20, %s1198_s20   ;;  %s863_s19 = sphi %s913_s19, %s1197_s19   ;;  %s859_s18 = sphi %s911_s18, %s1196_s18  }
   0x6   : > { %s936_s24 = sadd.s32 1, %s871_s21   ;;  %s28_s25 = sadd.s32 1, %s867_s20 }
   0x7   : > { %s25_s26 = ssub.s32 %s871_s21, %s936_s24  ;;  %p35_p0 = scmp.ne.s32.totalorder %s867_s20, %s863_s19 }
   0x8   : > { %p26_p1 = scmp.eq.s32.totalorder %s25_s26, 0  ;;  %p36_p2 = scmp.eq.s32.totalorder %s871_s21, 0 }
   0x9   : > { %p41_p3 = scmp.ne.s32.totalorder %s863_s19, %s859_s18  ;;  %p42_p4 = scmp.eq.s32.totalorder %s932_s22, 0 }
   0xa   : > { %s948_s27 = scalar_select %p26_p1, %s867_s20, %s28_s25  }
   0xb   : > { %p950_p5 = por %p36_p2, %p35_p0  ;;  %p954_p6 = por %p42_p4, %p41_p3 }
   0xc   : > { %p149_p7 = scmp.eq.s32.totalorder %s932_s22, 1  ;;  %p155_p8 = scmp.eq.s32.totalorder %s685_s23, 1 }
   0xd   : > { %s1188_s29 = scalar_select %p954_p6, 1, 0 }
   0xe   : > { %p739_p10 = scmp.lt.s32.totalorder %s871_s21, 2  ;;  %p961_p11 = por %p149_p7, %p35_p0 }
   0xf   : > { %p965_p12 = por %p155_p8, %p41_p3  ;;  %s187_s7 = sand.u32 1, %s867_s20  }
  0x10   : > { %s1189_s30 = scalar_select %p961_p11, 1, 0 }
  0x11   : > { %s1190_s6 = scalar_select %p965_p12, 1, 0 }
  0x12   : > { %s707_s8 = sshll.u32 %s871_s21, 11  ;;  %s688_s9 = sshll.u32 %s187_s7, 7 }
  0x13   : > { %s974_s12 = scalar_lea.hbm %s1179_s0, %s707_s8  ;;  %s191_s13 = scalar_lea.vmem [#allocation2], %s688_s9 }
  0x14   : > { %s199_s14 = sshll.u32 %s191_s13, 4  ;;  %p978_p13 = pnand %p739_p10, %p950_p5  ;;  %s982_s14 = int_to_ptr.vmem [resolvable:$true] %s199_s14 }
  0x15   : > { %s984_s16 = scalar_lea.sflag [#allocation3], %s187_s7  ;;  %s779_s17 = scalar_lea.hbm %s974_s12, 2048 }
  0x16   : > { %p780_p0 = scmp.ne.s32.totalorder %s974_s12, %s779_s17  ;;  %p781_p1 = pneg %p978_p13 }
  0x17   : > { %s784_s26 = scalar_lea.hbm %s1179_s0, 4096  ;;  %p785_p4 = scmp.lt.s32.totalorder %s974_s12, %s1179_s0 }
  0x18   : > { %p782_p2 = pnand %p781_p1, %p780_p0  ;;  %p786_p5 = scmp.lt.s32.totalorder %s784_s26, %s779_s17 }
  0x1a   : > { %p783_p3 = pneg %p782_p2  ;;  %p787_p7 = por %p786_p5, %p785_p4 }
  0x1c   : > { %p788_p8 = pnand %p787_p7, %p783_p3 }
  0x1e   : > { %791 = shalt.err (!%p788_p8)
}
  0x1f   : > { %s792_s7 = scalar_lea.vmem %s982_s14, 2048  ;;  %s873_s9 = smov [#allocation2]  }
  0x20   : > { %p793_p10 = scmp.ne.s32.totalorder %s982_s14, %s792_s7  ;;  %s797_s10 = sshll.u32 %s873_s9, 4  ;;  %s798_s10 = int_to_ptr.vmem [resolvable:$false] %s797_s10 }
  0x21   : > { %s799_s11 = scalar_lea.vmem %s798_s10, 4096  ;;  %p800_p2 = scmp.lt.s32.totalorder %s982_s14, %s798_s10 }
  0x22   : > { %p795_p9 = pnand %p793_p10, %p781_p1  ;;  %p801_p12 = scmp.lt.s32.totalorder %s799_s11, %s792_s7 }
  0x24   : > { %p796_p0 = pneg %p795_p9  ;;  %p802_p11 = por %p801_p12, %p800_p2 }
  0x26   : > { %p803_p6 = pnand %p802_p11, %p796_p0 }
  0x28   : > { %806 = shalt.err (!%p803_p6)
}
  0x29   : > { %s874_s13 = smov 256   ;;  %s875_s17 = smov 16  }
  0x2a   : > { %734 = dma.hbm_to_vmem [thread:$0]  (!%p978_p13), %s974_s12, 2048, %s982_s14, %s984_s16, %s874_s13, %s874_s13, %s875_s17  }
  0x2b   : > { %p692_p9 = scmp.ge.s32.totalorder %s871_s21, 1  ;;  %p207_p1 = scmp.lt.s32.totalorder %s871_s21, 3 }
  0x2d   : > { %p208_p3 = pnand %p692_p9, %p207_p1 }
  0x2e   : > { %s1008_s23 = sand.u32 (!%p208_p3), 1, %s863_s19   ;;  %p1192_p6 = scmp.ne.s32.totalorder (!%p208_p3), %s1188_s29, 0 }
  0x2f   : > { %211 = sbr.rel (%p208_p3) target bundleno = 762 (0x2fa), region = 40  ;;  %s693_s25 = sshll.u32 (!%p208_p3), %s1008_s23, 7 }
  0x30   : > { %s214_s26 = scalar_lea.sflag (!%p208_p3), [#allocation3], %s1008_s23  ;;  %s217_s28 = scalar_lea.vmem (!%p208_p3), [#allocation2], %s693_s25 }
  0x34   : > { %850 = dma.done.wait (%p1192_p6), %s214_s26, 2048  }
  0x35   : > { %852 = vsyncadd (%p1192_p6), %s214_s26, 4294965248  ;;  %v1018_v0 = vld [vmem:[%s217_s28 + $0x20] sm:$0xff]  ;;  %v1020_v1 = vld [vmem:[%s217_s28 + $0x28] sm:$0xff]  ;;  %v876_v24 = vmov 0.0   ;;  %vm877_vm0 = vmmov 0   ;;  %v311_v27 = vlaneseq  ;;  %vm322_vm1 = vcmask 130112  }
  0x36   : > { %v1022_v2 = vld [vmem:[%s217_s28] sm:$0xff]  ;;  %v268_v3 = vadd.f32 %v1020_v1, %v1018_v0  ;;  %v1026_v4 = vld [vmem:[%s217_s28 + $0x8] sm:$0xff]  ;;  %v1028_v5 = vld [vmem:[%s217_s28 + $0x30] sm:$0xff]  ;;  %715 = vmatprep.subr.mxu0 %v876_v24  ;;  %722 = vmatprep.subr.mxu1 %v876_v24  ;;  %vm351_vm2 = vcmask 1041409   ;;  %vm353_vm3 = vcmask 1042434   ;;  %vm355_vm4 = vcmask 1043459  }
  0x37   : > { %v1030_v6 = vld [vmem:[%s217_s28 + $0x38] sm:$0xff]  ;;  %v262_v7 = vadd.f32 %v1026_v4, %v1022_v2  ;;  %v1034_v8 = vld [vmem:[%s217_s28 + $0x10] sm:$0xff]  ;;  %v1046_v14 = vld [vmem:[%s217_s28 + $0x40] sm:$0xff]  ;;  %719 = vmatprep.mubr.msk.f32.mxu0 %vm877_vm0, %v876_v24  ;;  %724 = vmatprep.mubr.msk.f32.mxu1 %vm877_vm0, %v876_v24  ;;  %v312_v28 = vand.u32 127, %v311_v27  ;;  %v1072_v32 = vshrl.u32 %v311_v27, 7  ;;  %vm357_vm5 = vcmask 130048  }
  0x38   : > { %v1036_v9 = vld [vmem:[%s217_s28 + $0x18] sm:$0xff]  ;;  %269 = vadd.xlane.f32.xlu1 %v268_v3  ;;  %v271_v10 = vadd.f32 %v1030_v6, %v1028_v5  ;;  %v1042_v12 = vld [vmem:[%s217_s28 + $0x50] sm:$0xff]  ;;  %v1048_v15 = vld [vmem:[%s217_s28 + $0x48] sm:$0xff]  ;;  %vm443_vm6 = vcmask 1043456   ;;  %vm439_vm7 = vcmask 31744   ;;  %s1099_s13 = scalar_lea.vmem [#allocation5], %s693_s25 }
  0x39   : > { %263 = vadd.xlane.f32.xlu0 %v262_v7  ;;  %v265_v11 = vadd.f32 %v1036_v9, %v1034_v8  ;;  %v1044_v13 = vld [vmem:[%s217_s28 + $0x58] sm:$0xff]  ;;  %v274_v17 = vadd.f32 %v1048_v15, %v1046_v14  ;;  %v1054_v18 = vld [vmem:[%s217_s28 + $0x70] sm:$0xff]  ;;  %v1058_v20 = vld [vmem:[%s217_s28 + $0x60] sm:$0xff]  ;;  %v317_v31 = vadd.s32 4294967288, %v312_v28  ;;  %v315_v38 = vsub.s32 %v312_v28, %v1072_v32  ;;  %s709_s17 = sshll.u32 %s932_s22, 11  ;;  %s612_s25 = sshll.u32 %s1099_s13, 4  ;;  %s1132_s25 = int_to_ptr.vmem [resolvable:$true] %s612_s25 }
  0x3a   : > { %v277_v16 = vadd.f32 %v1044_v13, %v1042_v12  ;;  %v1056_v19 = vld [vmem:[%s217_s28 + $0x78] sm:$0xff]  ;;  %v1060_v21 = vld [vmem:[%s217_s28 + $0x68] sm:$0xff]  ;;  %v294_v26 = vld [vmem:[%s1180_s1] sm:$0xff]  ;;  %s1130_s29 = scalar_lea.hbm %s1184_s5, %s709_s17  ;;  %s598_s22 = scalar_lea.sflag [#allocation4], %s1008_s23 }
  0x3b   : > { %v283_v22 = vadd.f32 %v1056_v19, %v1054_v18  ;;  %v280_v23 = vadd.f32 %v1060_v21, %v1058_v20  ;;  %v295_v25 = vld [vmem:[%s1180_s1 + $0x8] sm:$0xff]  ;;  %v320_v35 = vsub.s32 %v317_v31, %v1072_v32  ;;  %v431_v3 = vld [vmem:[%s1182_s3] sm:$0xf]  ;;  %s807_s12 = scalar_lea.vmem %s1132_s25, 2048  ;;  %p1193_p12 = scmp.ne.s32.totalorder %s1189_s30, 0 }
  0x3c   : > { %272 = vadd.xlane.f32.xlu1 %v271_v10  ;;  %716 = vmatpush3.msra.mxu0 %v295_v25  ;;  %v695_v7 = vld [vmem:[%s1181_s2] ss:$0 sm:$0xff]  ;;  %p808_p11 = scmp.ne.s32.totalorder %s1132_s25, %s807_s12  ;;  %s878_s14 = smov [#allocation5]  }
  0x3d   : > { %266 = vadd.xlane.f32.xlu0 %v265_v11  ;;  %717 = vmatprep.subr.mxu0 %v876_v24  ;;  %s811_s15 = sshll.u32 %s878_s14, 4  ;;  %s812_s15 = int_to_ptr.vmem [resolvable:$false] %s811_s15 }
  0x3e   : > { %718 = vmatpush3.msra.mxu0 %v294_v26  ;;  %723 = vmatpush3.msk.msra.mxu1 %vm443_vm6, %v431_v3  ;;  %p809_p13 = pnand %p808_p11, %p1193_p12  ;;  %s813_s16 = scalar_lea.vmem %s812_s15, 4096 }
  0x3f   : > { %p814_p5 = scmp.lt.s32.totalorder %s1132_s25, %s812_s15  ;;  %p815_p7 = scmp.lt.s32.totalorder %s813_s16, %s807_s12 }
  0x40   : > { %278 = vadd.xlane.f32.xlu1 %v277_v16  ;;  %p810_p4 = pneg %p809_p13 }
  0x41   : > { %275 = vadd.xlane.f32.xlu0 %v274_v17  ;;  %p816_p8 = por %p815_p7, %p814_p5 }
  0x43   : > { %p817_p10 = pnand %p816_p8, %p810_p4 }
  0x44   : > { %284 = vadd.xlane.f32.xlu1 %v283_v22  ;;  %v697_v22 = vld [vmem:[%s1183_s4] ss:$0 sm:$0xff] }
  0x45   : > { %281 = vadd.xlane.f32.xlu0 %v280_v23 }
  0xc1   : > { %v270_v29 = vpop.xlane.xlu1 %269 }
  0xc2   : > { %v264_v30 = vpop.xlane.xlu0 %263  ;;  %v288_v39 = vmul.f32 0.00390625, %v270_v29  ;;  %v523_v29 = vsub.s32 0, %v1072_v32 }
  0xc3   : > { %v286_v40 = vmul.f32 0.00390625, %v264_v30 }
  0xc4   : > { %v327_v48 = vrot.slane %v288_v39, %v315_v38 }
  0xc5   : > { %v273_v33 = vpop.xlane.xlu1 %272  ;;  %v316_v49 = vrot.slane %v286_v40, %v315_v38 }
  0xc6   : > { %v267_v34 = vpop.xlane.xlu0 %266  ;;  %v289_v36 = vmul.f32 0.00390625, %v273_v33  ;;  %v534_v33 = vsub.s32 1, %v1072_v32 }
  0xc7   : > { %v287_v37 = vmul.f32 0.00390625, %v267_v34  ;;  %v545_v34 = vsub.s32 2, %v1072_v32 }
  0xc8   : > { %v331_v44 = vrot.slane %v289_v36, %v320_v35 }
  0xc9   : > { %v279_v41 = vpop.xlane.xlu1 %278  ;;  %v321_v45 = vrot.slane %v287_v37, %v320_v35  ;;  %v556_v37 = vsub.s32 3, %v1072_v32 }
  0xca   : > { %v291_v42 = vmul.f32 0.00390625, %v279_v41  ;;  %v276_v43 = vpop.xlane.xlu0 %275  ;;  %v332_v54 = vsel %vm322_vm1, %v331_v44, %v327_v48 }
  0xcb   : > { %v290_v46 = vmul.f32 0.00390625, %v276_v43  ;;  %v323_v55 = vsel %vm322_vm1, %v321_v45, %v316_v49 }
  0xcc   : > { %v340_v47 = vrot.slane %v291_v42, %v320_v35  ;;  %v352_v60 = vsel %vm351_vm2, %v332_v54, %v323_v55 }
  0xcd   : > { %v336_v50 = vrot.slane %v290_v46, %v315_v38  ;;  %v285_v51 = vpop.xlane.xlu1 %284 }
  0xce   : > { %v293_v52 = vmul.f32 0.00390625, %v285_v51  ;;  %v282_v53 = vpop.xlane.xlu0 %281 }
  0xcf   : > { %v292_v56 = vmul.f32 0.00390625, %v282_v53  ;;  %v341_v57 = vsel %vm322_vm1, %v340_v47, %v336_v50 }
  0xd0   : > { %v349_v58 = vrot.slane %v293_v52, %v320_v35  ;;  %v354_v62 = vsel %vm353_vm3, %v341_v57, %v352_v60 }
  0xd1   : > { %v345_v59 = vrot.slane %v292_v56, %v315_v38 }
  0xd3   : > { %v350_v61 = vsel %vm322_vm1, %v349_v58, %v345_v59 }
  0xd4   : > { %v356_v63 = vsel %vm355_vm4, %v350_v61, %v354_v62 }
  0xd5   : > { %720 = vmatmul.mubr.msk.f32.vlgmr.msra.gmra.mxu0 %vm357_vm5, %v356_v63 }
 0x195   : > { %v426_v10 = vpop.f32.mrf.mxu0 }
 0x196   : > { %v427_v11 = vadd.f32 %v695_v7, %v426_v10 }
 0x197   : > { %v721_v16 = vpop.f32.mrf.mxu0 }
 0x198   : > { %v430_v17 = vmax.f32 %v427_v11, 0.0 }
 0x19a   : > { %725 = vmatmul.mubr.msk.f32.vlgmr.msra.gmra.mxu1 %vm439_vm7, %v430_v17 }
 0x25a   : > { %v513_v23 = vpop.f32.mrf.mxu1 }
 0x25b   : > { %v514_v24 = vadd.f32 %v697_v22, %v513_v23 }
 0x25c   : > { %v726_v25 = vpop.f32.mrf.mxu1 }
 0x25d   : > { %v517_v26 = vadd.f32 3.0, %v514_v24 }
 0x25f   : > { %v518_v27 = vmax.f32 %v517_v26, 0.0 }
 0x261   : > { %v519_v28 = vmin.f32 %v518_v27, 6.0 }
 0x263   : > { %v520_v30 = vmul.f32 0.16666667, %v519_v28 }
 0x265   : > { %v524_v31 = vrot.slane %v520_v30, %v523_v29  ;;  %v535_v35 = vrot.slane %v520_v30, %v534_v33  ;;  %v546_v36 = vrot.slane %v520_v30, %v545_v34  ;;  %v557_v38 = vrot.slane %v520_v30, %v556_v37 }
 0x267   : > { %530 = vbcast.lane.b32.xlu1 %v524_v31, 264  ;;  %526 = vbcast.lane.b32.xlu0 %v524_v31, 256 }
 0x26b   : > { %537 = vbcast.lane.b32.xlu1 %v535_v35, 256  ;;  %548 = vbcast.lane.b32.xlu0 %v546_v36, 256 }
 0x26f   : > { %541 = vbcast.lane.b32.xlu1 %v535_v35, 264  ;;  %559 = vbcast.lane.b32.xlu0 %v557_v38, 256 }
 0x273   : > { %552 = vbcast.lane.b32.xlu1 %v546_v36, 264 }
 0x277   : > { %563 = vbcast.lane.b32.xlu1 %v557_v38, 264 }
 0x2d9   : > { %v531_v39 = vpop.permute.xlu1 %530  ;;  %v527_v40 = vpop.permute.xlu0 %526 }
 0x2da   : > { %v567_v41 = vmul.f32 %v531_v39, %v1034_v8  ;;  %v568_v42 = vmul.f32 %v531_v39, %v1036_v9  ;;  %v565_v43 = vmul.f32 %v527_v40, %v1022_v2  ;;  %v566_v44 = vmul.f32 %v527_v40, %v1026_v4 }
 0x2dc   : > { %583 = vst [vmem:[%s1099_s13 + $0x10] sm:$0xff] %v567_v41  ;;  %584 = vst [vmem:[%s1099_s13 + $0x18] sm:$0xff] %v568_v42 }
 0x2dd   : > { %581 = vst [vmem:[%s1099_s13] sm:$0xff] %v565_v43  ;;  %582 = vst [vmem:[%s1099_s13 + $0x8] sm:$0xff] %v566_v44  ;;  %v538_v8 = vpop.permute.xlu1 %537  ;;  %v549_v2 = vpop.permute.xlu0 %548 }
 0x2de   : > { %v569_v4 = vmul.f32 %v538_v8, %v1018_v0  ;;  %v570_v9 = vmul.f32 %v538_v8, %v1020_v1  ;;  %v573_v32 = vmul.f32 %v549_v2, %v1046_v14  ;;  %v574_v45 = vmul.f32 %v549_v2, %v1048_v15 }
 0x2e0   : > { %585 = vst [vmem:[%s1099_s13 + $0x20] sm:$0xff] %v569_v4  ;;  %586 = vst [vmem:[%s1099_s13 + $0x28] sm:$0xff] %v570_v9 }
 0x2e1   : > { %589 = vst [vmem:[%s1099_s13 + $0x40] sm:$0xff] %v573_v32  ;;  %590 = vst [vmem:[%s1099_s13 + $0x48] sm:$0xff] %v574_v45  ;;  %v542_v46 = vpop.permute.xlu1 %541  ;;  %v560_v47 = vpop.permute.xlu0 %559 }
 0x2e2   : > { %v571_v0 = vmul.f32 %v542_v46, %v1028_v5  ;;  %v572_v48 = vmul.f32 %v542_v46, %v1030_v6  ;;  %v577_v1 = vmul.f32 %v560_v47, %v1058_v20  ;;  %v578_v14 = vmul.f32 %v560_v47, %v1060_v21 }
 0x2e4   : > { %587 = vst [vmem:[%s1099_s13 + $0x30] sm:$0xff] %v571_v0  ;;  %588 = vst [vmem:[%s1099_s13 + $0x38] sm:$0xff] %v572_v48 }
 0x2e5   : > { %593 = vst [vmem:[%s1099_s13 + $0x60] sm:$0xff] %v577_v1  ;;  %594 = vst [vmem:[%s1099_s13 + $0x68] sm:$0xff] %v578_v14  ;;  %v553_v15 = vpop.permute.xlu1 %552 }
 0x2e6   : > { %v575_v49 = vmul.f32 %v553_v15, %v1042_v12  ;;  %v576_v50 = vmul.f32 %v553_v15, %v1044_v13 }
 0x2e8   : > { %591 = vst [vmem:[%s1099_s13 + $0x50] sm:$0xff] %v575_v49  ;;  %592 = vst [vmem:[%s1099_s13 + $0x58] sm:$0xff] %v576_v50 }
 0x2e9   : > { %v564_v5 = vpop.permute.xlu1 %563 }
 0x2ea   : > { %v579_v6 = vmul.f32 %v564_v5, %v1054_v18  ;;  %v580_v12 = vmul.f32 %v564_v5, %v1056_v19 }
 0x2ec   : > { %595 = vst [vmem:[%s1099_s13 + $0x70] sm:$0xff] %v579_v6  ;;  %596 = vst [vmem:[%s1099_s13 + $0x78] sm:$0xff] %v580_v12 }
 0x2ed   : > { %820 = shalt.err (!%p817_p10)
}
 0x2ee   : > { %s821_s8 = scalar_lea.hbm %s1130_s29, 2048  ;;  %s825_s10 = scalar_lea.hbm %s1184_s5, 4096 }
 0x2ef   : > { %p822_p0 = scmp.ne.s32.totalorder %s1130_s29, %s821_s8  ;;  %p826_p1 = scmp.lt.s32.totalorder %s1130_s29, %s1184_s5 }
 0x2f0   : > { %p827_p3 = scmp.lt.s32.totalorder %s825_s10, %s821_s8 }
 0x2f1   : > { %p823_p2 = pnand %p822_p0, %p1193_p12 }
 0x2f2   : > { %p828_p6 = por %p827_p3, %p826_p1 }
 0x2f3   : > { %p824_p9 = pneg %p823_p2 }
 0x2f5   : > { %p829_p11 = pnand %p828_p6, %p824_p9 }
 0x2f7   : > { %832 = shalt.err (!%p829_p11)
}
 0x2f8   : > { %s879_s17 = smov 256   ;;  %s880_s26 = smov 16  }
 0x2f9   : > { %729 = dma.vmem_to_hbm [thread:$0]  (%p1193_p12), %s1132_s25, 2048, %s1130_s29, %s598_s22, %s879_s17, %s879_s17, %s880_s26  }
 0x2fa PF: > { %s627_s28 = sand.u32 1, %s859_s18   ;;  %p1194_p13 = scmp.ne.s32.totalorder %s1190_s6, 0 }
 0x2fb   : > { %p1195_p4 = scmp.ge.s32.totalorder %s871_s21, 2  ;;  %s628_s12 = scalar_lea.sflag [#allocation4], %s627_s28 }
 0x2fd   : > { %p736_p5 = pnand %p1195_p4, %p1194_p13 }
 0x2ff   : > { %p737_p7 = pneg %p736_p5 }
 0x301   : > { %854 = dma.done.wait (%p737_p7), %s628_s12, 2048  }
 0x302   : > { %856 = vsyncadd (%p737_p7), %s628_s12, 4294965248  ;;  %p18_p8 = scmp.ge.s32.totalorder %s936_s24, 4   ;;  %s1196_s18 = smov %s863_s19 }
 0x303   : > { %s1197_s19 = smov %s867_s20  ;;  %s1198_s20 = smov %s948_s27 }
 0x304   : > { %s1199_s21 = smov %s936_s24  ;;  %20 = sbr.rel (!%p18_p8) target bundleno = 5 (0x5), region = 85 }
 0x309   :  { %633 = vsyncpa [#allocation3], 1 }
 0x30a   :  { %635 = vsyncpa [#allocation3 + $0x1], 1 }
 0x30b   :  { %636 = vsyncpa [#allocation4], 1 }
 0x30c   :  { %638 = vsyncpa [#allocation4 + $0x1], 1 }

</bundles_post_ra>
